<compile_context>
chip_gen: v7x
topology: tpu7x:2x2x1
jax: 0.10.0
libtpu: 0.0.40
codegen_flags: <defaults>
</compile_context>

<pallas_src>
from functools import partial

import jax
import jax.numpy as jnp
from jax.experimental import pallas as pl
from jax.experimental.pallas import tpu as pltpu

_LANE = 128


def _action_predictor_kernel(x_ref, w1_ref, b1_ref, w2_ref, b2_ref,
                             w3t_ref, b3_ref, o_ref, *, use_bf16_matmul):
    x = x_ref[...]                          # (S, TB)  state, batch on lanes
    w1 = w1_ref[...]                        # (H, S)   PyTorch-native (out, in)
    state_dim = x.shape[0]

    # ---- Layer 1: K = state_dim (tiny) -> VPU broadcast FMAs, skip the MXU. ----
    acc = w1[:, 0:1] * x[0:1, :] + b1_ref[...]          # (H, TB)
    for s in range(1, state_dim):                       # static unroll, S is tiny
        acc = acc + w1[:, s:s + 1] * x[s:s + 1, :]
    h1 = jnp.tanh(acc)                                  # (H, TB) f32

    # ---- Layer 2: the only real matmul (H x H) on the MXU. ----
    w2 = w2_ref[...]                                    # (H, H)
    if use_bf16_matmul:
        # v6e/v7x: bf16-native MXU; keep the accumulate + tanh in f32.
        h2_pre = jnp.dot(w2.astype(jnp.bfloat16), h1.astype(jnp.bfloat16),
                         preferred_element_type=jnp.float32)
    else:
        h2_pre = jnp.dot(w2, h1, preferred_element_type=jnp.float32)
    h2 = jnp.tanh(h2_pre + b2_ref[...])                 # (H, TB) f32

    # ---- Layer 3: action head. ----
    w3t = w3t_ref[...]                                  # (H, A)
    if w3t.shape[1] == 1:
        # A == 1 (Pendulum): elementwise mul + sublane reduce (VPU + XLU);
        # avoids an N=1 matmul that would use 1/256 of the MXU output columns.
        a_pre = jnp.sum(w3t * h2, axis=0, keepdims=True)            # (1, TB)
    else:
        a_pre = jax.lax.dot_general(
            w3t, h2, (((0,), (0,)), ((), ())),
            preferred_element_type=jnp.float32)                     # (A, TB)
    a = jnp.tanh(a_pre + b3_ref[...])                               # (A, TB)
    o_ref[...] = (3.0 * a).astype(o_ref.dtype)


def action_predictor_forward(state, params, *, tile_b=None, use_bf16_matmul=False):
    """state: (batch, state_dim) f32.  params in PyTorch-native layout:
       w1 (H, S), b1 (H,), w2 (H, H), b2 (H,), w3 (A, H), b3 (A,).
       Returns (batch, action_dim) f32."""
    w1, b1 = params["w1"], params["b1"]
    w2, b2 = params["w2"], params["b2"]
    w3, b3 = params["w3"], params["b3"]

    batch, state_dim = state.shape
    hidden = w1.shape[0]
    action_dim = w3.shape[0]

    # Batch tile: multiple of 128 lanes so every store is a full-lane vst.
    if tile_b is None:
        tile_b = min(512, _LANE * pl.cdiv(batch, _LANE))
    n_tiles = pl.cdiv(batch, tile_b)
    batch_p = n_tiles * tile_b

    # Layout plumbing (host side, negligible): batch onto the lane axis, pad
    # batch up to the tile size, reshape biases to columns.
    x_t = jnp.transpose(state)                                   # (S, B)
    if batch_p != batch:
        x_t = jnp.pad(x_t, ((0, 0), (0, batch_p - batch)))
    b1c = b1.reshape(hidden, 1)
    b2c = b2.reshape(hidden, 1)
    w3t = jnp.transpose(w3)                                      # (H, A)
    b3c = b3.reshape(action_dim, 1)

    const = lambda shape: pl.BlockSpec(shape, lambda i: (0, 0))  # VMEM-resident

    out_t = pl.pallas_call(
        partial(_action_predictor_kernel, use_bf16_matmul=use_bf16_matmul),
        out_shape=jax.ShapeDtypeStruct((action_dim, batch_p), jnp.float32),
        grid=(n_tiles,),
        in_specs=[
            pl.BlockSpec((state_dim, tile_b), lambda i: (0, i)),  # pipelined state
            const(w1.shape), const((hidden, 1)),
            const(w2.shape), const((hidden, 1)),
            const((hidden, action_dim)), const((action_dim, 1)),
        ],
        out_specs=pl.BlockSpec((action_dim, tile_b), lambda i: (0, i)),
        compiler_params=pltpu.CompilerParams(
            dimension_semantics=("parallel",)),   # megacore-shardable on v7x
    )(x_t, w1, b1c, w2, b2c, w3t, b3c)

    return jnp.transpose(out_t[:, :batch])                       # (B, A)


def init_params(key, state_dim, action_dim, hidden_dim=64):
    """Deterministic synthetic init, PyTorch nn.Linear layout: w (out, in), b (out,)."""
    ks = jax.random.split(key, 6)

    def lin(kw, kb, fan_in, fan_out):
        bound = 1.0 / jnp.sqrt(jnp.float32(fan_in))
        w = jax.random.uniform(kw, (fan_out, fan_in), jnp.float32, -bound, bound)
        b = jax.random.uniform(kb, (fan_out,), jnp.float32, -bound, bound)
        return w, b

    w1, b1 = lin(ks[0], ks[1], state_dim, hidden_dim)
    w2, b2 = lin(ks[2], ks[3], hidden_dim, hidden_dim)
    w3, b3 = lin(ks[4], ks[5], hidden_dim, action_dim)
    return {"w1": w1, "b1": b1, "w2": w2, "b2": b2, "w3": w3, "b3": b3}


def reference_forward(state, p):
    hp = jax.lax.Precision.HIGHEST
    h1 = jnp.tanh(jnp.dot(state, p["w1"].T, precision=hp) + p["b1"])
    h2 = jnp.tanh(jnp.dot(h1, p["w2"].T, precision=hp) + p["b2"])
    return 3.0 * jnp.tanh(jnp.dot(h2, p["w3"].T, precision=hp) + p["b3"])


if __name__ == "__main__":
    # Pendulum-v1: state_dim=3 (cos θ, sin θ, θ̇), action_dim=1, hidden=64.
    state_dim, action_dim, hidden_dim = 3, 1, 64

    key = jax.random.PRNGKey(0)
    k_params, k_small, k_big = jax.random.split(key, 3)
    params = init_params(k_params, state_dim, action_dim, hidden_dim)

    # Small environment-step-sized batch (padded to one 128-lane tile).
    state_small = jax.random.normal(k_small, (8, state_dim), jnp.float32)
    out_small = jax.block_until_ready(action_predictor_forward(state_small, params))
    ref_small = reference_forward(state_small, params)
    assert out_small.shape == (8, action_dim)
    assert jnp.allclose(out_small, ref_small, atol=1e-5, rtol=1e-5), "small-batch mismatch"

    # Larger batch exercising the multi-step parallel grid + padding path.
    state_big = jax.random.normal(k_big, (700, state_dim), jnp.float32)
    out_big = jax.block_until_ready(action_predictor_forward(state_big, params))
    ref_big = reference_forward(state_big, params)
    assert out_big.shape == (700, action_dim)
    assert jnp.allclose(out_big, ref_big, atol=1e-5, rtol=1e-5), "big-batch mismatch"

    print("KERNEL_OK")
</pallas_src>

<mosaic_0001>
module attributes {stable_mosaic.version = 11 : i64} {
  func.func @_action_predictor_kernel(%arg0: i32, %arg1: memref<3x128xf32, #tpu.memory_space<vmem>>, %arg2: memref<64x3xf32, #tpu.memory_space<vmem>>, %arg3: memref<64x1xf32, #tpu.memory_space<vmem>>, %arg4: memref<64x64xf32, #tpu.memory_space<vmem>>, %arg5: memref<64x1xf32, #tpu.memory_space<vmem>>, %arg6: memref<64x1xf32, #tpu.memory_space<vmem>>, %arg7: memref<1x1xf32, #tpu.memory_space<vmem>>, %arg8: memref<1x128xf32, #tpu.memory_space<vmem>>) attributes {dimension_semantics = [#tpu.dimension_semantics<parallel>], iteration_bounds = array<i64: 1>, scalar_prefetch = 0 : i64, scratch_operands = 0 : i64, tpu.core_type = #tpu.core_type<tc>, window_params = [{transform_indices = @transform_0, window_bounds = array<i64: 3, 128>}, {pipeline_mode = #tpu.pipeline_mode<synchronous>, transform_indices = @transform_1, window_bounds = array<i64: 64, 3>}, {pipeline_mode = #tpu.pipeline_mode<synchronous>, transform_indices = @transform_2, window_bounds = array<i64: 64, 1>}, {pipeline_mode = #tpu.pipeline_mode<synchronous>, transform_indices = @transform_3, window_bounds = array<i64: 64, 64>}, {pipeline_mode = #tpu.pipeline_mode<synchronous>, transform_indices = @transform_4, window_bounds = array<i64: 64, 1>}, {pipeline_mode = #tpu.pipeline_mode<synchronous>, transform_indices = @transform_5, window_bounds = array<i64: 64, 1>}, {pipeline_mode = #tpu.pipeline_mode<synchronous>, transform_indices = @transform_6, window_bounds = array<i64: 1, 1>}, {transform_indices = @transform_7, window_bounds = array<i64: 1, 128>}]} {
    %c0 = arith.constant 0 : index
    %c0_0 = arith.constant 0 : index
    %0 = vector.load %arg1[%c0, %c0_0] : memref<3x128xf32, #tpu.memory_space<vmem>>, vector<3x128xf32>
    %c0_1 = arith.constant 0 : index
    %c0_2 = arith.constant 0 : index
    %1 = vector.load %arg2[%c0_1, %c0_2] : memref<64x3xf32, #tpu.memory_space<vmem>>, vector<64x3xf32>
    %2 = vector.extract_strided_slice %1 {offsets = [0, 0], sizes = [64, 1], strides = [1, 1]} : vector<64x3xf32> to vector<64x1xf32>
    %3 = vector.extract_strided_slice %0 {offsets = [0, 0], sizes = [1, 128], strides = [1, 1]} : vector<3x128xf32> to vector<1x128xf32>
    %4 = vector.broadcast %2 : vector<64x1xf32> to vector<64x128xf32>
    %5 = vector.broadcast %3 : vector<1x128xf32> to vector<64x128xf32>
    %6 = arith.mulf %4, %5 : vector<64x128xf32>
    %c0_3 = arith.constant 0 : index
    %c0_4 = arith.constant 0 : index
    %7 = vector.load %arg3[%c0_3, %c0_4] : memref<64x1xf32, #tpu.memory_space<vmem>>, vector<64x1xf32>
    %8 = vector.broadcast %7 : vector<64x1xf32> to vector<64x128xf32>
    %9 = arith.addf %6, %8 : vector<64x128xf32>
    %10 = vector.extract_strided_slice %1 {offsets = [0, 1], sizes = [64, 1], strides = [1, 1]} : vector<64x3xf32> to vector<64x1xf32>
    %11 = vector.extract_strided_slice %0 {offsets = [1, 0], sizes = [1, 128], strides = [1, 1]} : vector<3x128xf32> to vector<1x128xf32>
    %12 = vector.broadcast %10 : vector<64x1xf32> to vector<64x128xf32>
    %13 = vector.broadcast %11 : vector<1x128xf32> to vector<64x128xf32>
    %14 = arith.mulf %12, %13 : vector<64x128xf32>
    %15 = arith.addf %9, %14 : vector<64x128xf32>
    %16 = vector.extract_strided_slice %1 {offsets = [0, 2], sizes = [64, 1], strides = [1, 1]} : vector<64x3xf32> to vector<64x1xf32>
    %17 = vector.extract_strided_slice %0 {offsets = [2, 0], sizes = [1, 128], strides = [1, 1]} : vector<3x128xf32> to vector<1x128xf32>
    %18 = vector.broadcast %16 : vector<64x1xf32> to vector<64x128xf32>
    %19 = vector.broadcast %17 : vector<1x128xf32> to vector<64x128xf32>
    %20 = arith.mulf %18, %19 : vector<64x128xf32>
    %21 = arith.addf %15, %20 : vector<64x128xf32>
    %22 = math.tanh %21 : vector<64x128xf32>
    %c0_5 = arith.constant 0 : index
    %c0_6 = arith.constant 0 : index
    %23 = vector.load %arg4[%c0_5, %c0_6] : memref<64x64xf32, #tpu.memory_space<vmem>>, vector<64x64xf32>
    %cst = arith.constant dense<0.000000e+00> : vector<64x128xf32>
    %24 = tpu.matmul %23, %22, %cst {dimension_numbers = #tpu.dot_dimension_numbers<[1], [0], [0], [1], [0, 0, 1, 1], [], []>} : vector<64x64xf32>, vector<64x128xf32>, vector<64x128xf32> -> vector<64x128xf32>
    %c0_7 = arith.constant 0 : index
    %c0_8 = arith.constant 0 : index
    %25 = vector.load %arg5[%c0_7, %c0_8] : memref<64x1xf32, #tpu.memory_space<vmem>>, vector<64x1xf32>
    %26 = vector.broadcast %25 : vector<64x1xf32> to vector<64x128xf32>
    %27 = arith.addf %24, %26 : vector<64x128xf32>
    %28 = math.tanh %27 : vector<64x128xf32>
    %c0_9 = arith.constant 0 : index
    %c0_10 = arith.constant 0 : index
    %29 = vector.load %arg6[%c0_9, %c0_10] : memref<64x1xf32, #tpu.memory_space<vmem>>, vector<64x1xf32>
    %30 = vector.broadcast %29 : vector<64x1xf32> to vector<64x128xf32>
    %31 = arith.mulf %30, %28 : vector<64x128xf32>
    %cst_11 = arith.constant dense<0.000000e+00> : vector<128xf32>
    %32 = vector.multi_reduction <add>, %31, %cst_11 [0] : vector<64x128xf32> to vector<128xf32>
    %33 = vector.shape_cast %32 : vector<128xf32> to vector<1x128xf32>
    %c0_12 = arith.constant 0 : index
    %c0_13 = arith.constant 0 : index
    %34 = vector.load %arg7[%c0_12, %c0_13] : memref<1x1xf32, #tpu.memory_space<vmem>>, vector<1x1xf32>
    %35 = vector.broadcast %34 : vector<1x1xf32> to vector<1x128xf32>
    %36 = arith.addf %33, %35 : vector<1x128xf32>
    %37 = math.tanh %36 : vector<1x128xf32>
    %cst_14 = arith.constant 3.000000e+00 : f32
    %38 = vector.broadcast %cst_14 : f32 to vector<1x128xf32>
    %39 = arith.mulf %38, %37 : vector<1x128xf32>
    %c0_15 = arith.constant 0 : index
    %c0_16 = arith.constant 0 : index
    %40 = vector.load %arg8[%c0_15, %c0_16] : memref<1x128xf32, #tpu.memory_space<vmem>>, vector<1x128xf32>
    tpu.vector_store %arg8[%c0_15, %c0_16], %39 {strides = array<i32>} : memref<1x128xf32, #tpu.memory_space<vmem>>, vector<1x128xf32>,
    return
  }
  func.func @transform_0(%arg0: i32) -> (i32, i32) {
    %c0_i32 = arith.constant 0 : i32
    %c0_i32_0 = arith.constant 0 : i32
    return %c0_i32, %arg0 : i32, i32
  }
  func.func @transform_1(%arg0: i32) -> (i32, i32) {
    %c0_i32 = arith.constant 0 : i32
    %c0_i32_0 = arith.constant 0 : i32
    %c0_i32_1 = arith.constant 0 : i32
    return %c0_i32, %c0_i32_0 : i32, i32
  }
  func.func @transform_2(%arg0: i32) -> (i32, i32) {
    %c0_i32 = arith.constant 0 : i32
    %c0_i32_0 = arith.constant 0 : i32
    %c0_i32_1 = arith.constant 0 : i32
    return %c0_i32, %c0_i32_0 : i32, i32
  }
  func.func @transform_3(%arg0: i32) -> (i32, i32) {
    %c0_i32 = arith.constant 0 : i32
    %c0_i32_0 = arith.constant 0 : i32
    %c0_i32_1 = arith.constant 0 : i32
    return %c0_i32, %c0_i32_0 : i32, i32
  }
  func.func @transform_4(%arg0: i32) -> (i32, i32) {
    %c0_i32 = arith.constant 0 : i32
    %c0_i32_0 = arith.constant 0 : i32
    %c0_i32_1 = arith.constant 0 : i32
    return %c0_i32, %c0_i32_0 : i32, i32
  }
  func.func @transform_5(%arg0: i32) -> (i32, i32) {
    %c0_i32 = arith.constant 0 : i32
    %c0_i32_0 = arith.constant 0 : i32
    %c0_i32_1 = arith.constant 0 : i32
    return %c0_i32, %c0_i32_0 : i32, i32
  }
  func.func @transform_6(%arg0: i32) -> (i32, i32) {
    %c0_i32 = arith.constant 0 : i32
    %c0_i32_0 = arith.constant 0 : i32
    %c0_i32_1 = arith.constant 0 : i32
    return %c0_i32, %c0_i32_0 : i32, i32
  }
  func.func @transform_7(%arg0: i32) -> (i32, i32) {
    %c0_i32 = arith.constant 0 : i32
    %c0_i32_0 = arith.constant 0 : i32
    return %c0_i32, %arg0 : i32, i32
  }
}

</mosaic_0001>

<bundles_post_ra>
// kernel: tpu_custom_call.1
= control target key start
LH: loop header
LB: loop body
LE: loop exit
PB: predicated region body
PF: predicated region fallthrough
CT: control target
= control target key end

     0   :  { %s955_s0 = inlined_call_operand.vmem [shape: f32[3,128], index: 0, kind: input, shape index: {}]   ;;  %s956_s1 = inlined_call_operand.vmem [shape: f32[64,3], index: 1, kind: input, shape index: {}]   ;;  %s957_s2 = inlined_call_operand.vmem [shape: f32[64,1], index: 2, kind: input, shape index: {}]   ;;  %s958_s3 = inlined_call_operand.vmem [shape: f32[64,64], index: 3, kind: input, shape index: {}]   ;;  %s959_s4 = inlined_call_operand.vmem [shape: f32[64,1], index: 4, kind: input, shape index: {}]   ;;  %s960_s5 = inlined_call_operand.vmem [shape: f32[64,1], index: 5, kind: input, shape index: {}]   ;;  %s961_s6 = inlined_call_operand.<no memory space> [shape: f32[1,1], index: 6, kind: input, shape index: {}]   ;;  %s962_s7 = inlined_call_operand.hbm [shape: f32[1,128], index: 7, kind: output, shape index: {}]  }
   0x1   :  { %v12_v0 = vstv %s961_s6 }
   0x2   :  { %13 = vst [vmem:[#allocation2] sm:$0x1] %v12_v0 }
   0x3   :  { %v90_v1 = vld [vmem:[%s957_s2] sm:$0xff]  ;;  %v707_v3 = vmov 0   ;;  %v91_v4 = vld [vmem:[%s957_s2 + $0x8] sm:$0xff] }
   0x4   :  { %v30_v2 = vld [vmem:[%s956_s1] sm:$0xff]  ;;  %630 = vset.pattern.permute.xlu1 %v707_v3  ;;  %629 = vset.pattern.permute.xlu0 %v707_v3  ;;  %v31_v5 = vld [vmem:[%s956_s1 + $0x8] sm:$0xff] }
   0x5   :  { %100 = vperm.xlu1 %630, %v90_v1   ;;  %40 = vperm.xlu0 %629, %v30_v2  }
   0x6   :  { %14 = vsyncpa [#allocation4], 0  ;;  %v33_v6 = vld [vmem:[%s956_s1 + $0x18] sm:$0xff]  ;;  %v708_v7 = vmov 1   ;;  %v92_v8 = vld [vmem:[%s957_s2 + $0x10] sm:$0xff]  ;;  %v709_v12 = vmov 2   ;;  %v78_v44 = vlaneseq }
   0x7   :  { %v32_v9 = vld [vmem:[%s956_s1 + $0x10] sm:$0xff]  ;;  %v35_v10 = vld [vmem:[%s956_s1 + $0x28] sm:$0xff]  ;;  %v94_v11 = vld [vmem:[%s957_s2 + $0x20] sm:$0xff]  ;;  %vm314_vm0 = vcmask 523264  }
   0x8   :  { %v37_v13 = vld [vmem:[%s956_s1 + $0x38] sm:$0xff]  ;;  %v96_v15 = vld [vmem:[%s957_s2 + $0x30] sm:$0xff]  ;;  %v34_v16 = vld [vmem:[%s956_s1 + $0x20] sm:$0xff]  ;;  %v870_v48 = vshrl.u32 %v78_v44, 7 }
   0x9   :  { %105 = vperm.xlu1 %630, %v91_v4   ;;  %45 = vperm.xlu0 %629, %v31_v5   ;;  %v93_v14 = vld [vmem:[%s957_s2 + $0x18] sm:$0xff]  ;;  %v36_v17 = vld [vmem:[%s956_s1 + $0x30] sm:$0xff]  ;;  %v95_v18 = vld [vmem:[%s957_s2 + $0x28] sm:$0xff] }
   0xa   :  { %v97_v19 = vld [vmem:[%s957_s2 + $0x38] sm:$0xff]  ;;  %v258_v20 = vld [vmem:[%s958_s3] sm:$0xff]  ;;  %v267_v23 = vld [vmem:[%s959_s4 + $0x8] sm:$0xff]  ;;  %v80_v52 = vsub.s32 0, %v870_v48  ;;  %v180_v53 = vsub.s32 1, %v870_v48  ;;  %v232_v59 = vsub.s32 2, %v870_v48 }
   0xb   :  { %v262_v21 = vld [vmem:[%s958_s3 + $0x20] sm:$0xff]  ;;  %589 = vmatprep.mubr.msk.f32.mxu0 %vm314_vm0, %v258_v20  ;;  %v268_v24 = vld [vmem:[%s959_s4 + $0x10] sm:$0xff]  ;;  %v271_v25 = vld [vmem:[%s959_s4 + $0x28] sm:$0xff] }
   0xc   :  { %595 = vmatprep.mubr.msk.f32.mxu1 %vm314_vm0, %v262_v21  ;;  %v266_v22 = vld [vmem:[%s959_s4] sm:$0xff]  ;;  %v269_v26 = vld [vmem:[%s959_s4 + $0x18] sm:$0xff]  ;;  %v453_v29 = vld [vmem:[%s960_s5 + $0x8] sm:$0xff] }
   0xd   :  { %631 = vset.pattern.permute.xlu1 %v708_v7  ;;  %55 = vperm.xlu0 %629, %v33_v6   ;;  %v273_v27 = vld [vmem:[%s959_s4 + $0x38] sm:$0xff]  ;;  %v270_v28 = vld [vmem:[%s959_s4 + $0x20] sm:$0xff]  ;;  %v272_v30 = vld [vmem:[%s959_s4 + $0x30] sm:$0xff] }
   0xe   :  { %151 = vperm.xlu1 %631, %v31_v5   ;;  %v455_v33 = vld [vmem:[%s960_s5 + $0x18] sm:$0xff]  ;;  %v452_v34 = vld [vmem:[%s960_s5] sm:$0xff]  ;;  %v457_v37 = vld [vmem:[%s960_s5 + $0x28] sm:$0xff] }
   0xf   :  { %v454_v38 = vld [vmem:[%s960_s5 + $0x10] sm:$0xff]  ;;  %v459_v40 = vld [vmem:[%s960_s5 + $0x38] sm:$0xff]  ;;  %v456_v42 = vld [vmem:[%s960_s5 + $0x20] sm:$0xff] }
  0x10   :  { %v458_v46 = vld [vmem:[%s960_s5 + $0x30] sm:$0xff]  ;;  %v521_v49 = vld [vmem:[#allocation2] sm:$0x1] }
  0x11   :  { %110 = vperm.xlu0 %629, %v92_v8   ;;  %v29_v54 = vld [vmem:[%s955_s0] sm:$0x7] }
  0x12   :  { %632 = vset.pattern.permute.xlu1 %v707_v3  ;;  %v881_v57 = vrot.slane %v29_v54, %v80_v52  ;;  %v883_v58 = vrot.slane %v29_v54, %v180_v53  ;;  %v890_v0 = vrot.slane %v29_v54, %v232_v59 }
  0x13   :  { %50 = vperm.xlu1 %632, %v32_v9  }
  0x15   :  { %65 = vperm.xlu0 %629, %v35_v10  }
  0x17   :  { %633 = vset.pattern.permute.xlu1 %v709_v12 }
  0x18   :  { %199 = vperm.xlu1 %633, %v30_v2  }
  0x19   :  { %120 = vperm.xlu0 %629, %v94_v11  }
  0x1c   :  { %203 = vperm.xlu1 %633, %v31_v5  }
  0x1d   :  { %75 = vperm.xlu0 %629, %v37_v13  }
  0x20   :  { %634 = vset.pattern.permute.xlu1 %v707_v3 }
  0x21   :  { %115 = vperm.xlu1 %634, %v93_v14   ;;  %130 = vperm.xlu0 %629, %v96_v15  }
  0x25   :  { %635 = vset.pattern.permute.xlu1 %v708_v7  ;;  %642 = vset.pattern.permute.xlu0 %v708_v7 }
  0x26   :  { %159 = vperm.xlu1 %635, %v33_v6   ;;  %147 = vperm.xlu0 %642, %v30_v2  }
  0x2a   :  { %636 = vset.pattern.permute.xlu1 %v707_v3  ;;  %155 = vperm.xlu0 %642, %v32_v9  }
  0x2b   :  { %60 = vperm.xlu1 %636, %v34_v16  }
  0x2e   :  { %163 = vperm.xlu0 %642, %v34_v16  }
  0x2f   :  { %637 = vset.pattern.permute.xlu1 %v709_v12 }
  0x30   :  { %207 = vperm.xlu1 %637, %v32_v9  }
  0x32   :  { %171 = vperm.xlu0 %642, %v36_v17  }
  0x34   :  { %211 = vperm.xlu1 %637, %v33_v6  }
  0x36   :  { %646 = vset.pattern.permute.xlu0 %v709_v12 }
  0x37   :  { %227 = vperm.xlu0 %646, %v37_v13  }
  0x38   :  { %638 = vset.pattern.permute.xlu1 %v707_v3 }
  0x39   :  { %125 = vperm.xlu1 %638, %v95_v18  }
  0x3b   :  { %648 = vset.pattern.permute.xlu0 %v707_v3 }
  0x3c   :  { %286 = vperm.xlu0 %648, %v268_v24  }
  0x3d   :  { %639 = vset.pattern.permute.xlu1 %v708_v7 }
  0x3e   :  { %167 = vperm.xlu1 %639, %v35_v10  }
  0x40   :  { %301 = vperm.xlu0 %648, %v271_v25  }
  0x42   :  { %640 = vset.pattern.permute.xlu1 %v707_v3 }
  0x43   :  { %70 = vperm.xlu1 %640, %v36_v17  }
  0x44   :  { %311 = vperm.xlu0 %648, %v273_v27  }
  0x47   :  { %641 = vset.pattern.permute.xlu1 %v709_v12 }
  0x48   :  { %215 = vperm.xlu1 %641, %v34_v16   ;;  %467 = vperm.xlu0 %648, %v453_v29  }
  0x4c   :  { %219 = vperm.xlu1 %641, %v35_v10   ;;  %477 = vperm.xlu0 %648, %v455_v33  }
  0x50   :  { %643 = vset.pattern.permute.xlu1 %v707_v3  ;;  %487 = vperm.xlu0 %648, %v457_v37  }
  0x51   :  { %135 = vperm.xlu1 %643, %v97_v19  }
  0x54   :  { %497 = vperm.xlu0 %648, %v459_v40  }
  0x55   :  { %644 = vset.pattern.permute.xlu1 %v708_v7 }
  0x56   :  { %175 = vperm.xlu1 %644, %v37_v13  }
  0x5a   :  { %645 = vset.pattern.permute.xlu1 %v709_v12 }
  0x5b   :  { %223 = vperm.xlu1 %645, %v36_v17  }
  0x5f   :  { %647 = vset.pattern.permute.xlu1 %v707_v3 }
  0x60   :  { %276 = vperm.xlu1 %647, %v266_v22  }
  0x64   :  { %281 = vperm.xlu1 %647, %v267_v23  }
  0x68   :  { %291 = vperm.xlu1 %647, %v269_v26  }
  0x6c   :  { %296 = vperm.xlu1 %647, %v270_v28  }
  0x70   :  { %306 = vperm.xlu1 %647, %v272_v30  }
  0x74   :  { %462 = vperm.xlu1 %647, %v452_v34  }
  0x78   :  { %472 = vperm.xlu1 %647, %v454_v38  }
  0x7c   :  { %482 = vperm.xlu1 %647, %v456_v42  }
  0x80   :  { %492 = vperm.xlu1 %647, %v458_v46  }
  0x84   :  { %v101_v31 = vpop.permute.xlu1 %100  ;;  %v41_v32 = vpop.permute.xlu0 %40  ;;  %524 = vperm.xlu1 %647, %v521_v49  }
  0x85   :  { %v82_v1 = vmul.f32 %v881_v57, %v41_v32 }
  0x87   :  { %v138_v7 = vadd.f32 %v101_v31, %v82_v1 }
  0x88   :  { %v106_v35 = vpop.permute.xlu1 %105  ;;  %v46_v36 = vpop.permute.xlu0 %45 }
  0x89   :  { %v83_v60 = vmul.f32 %v881_v57, %v46_v36 }
  0x8b   :  { %v139_v2 = vadd.f32 %v106_v35, %v83_v60 }
  0x8c   :  { %v56_v39 = vpop.permute.xlu0 %55 }
  0x8d   :  { %v152_v41 = vpop.permute.xlu1 %151  ;;  %v85_v17 = vmul.f32 %v881_v57, %v56_v39 }
  0x8e   :  { %v183_v63 = vmul.f32 %v883_v58, %v152_v41 }
  0x90   :  { %v111_v43 = vpop.permute.xlu0 %110  ;;  %v191_v4 = vadd.f32 %v183_v63, %v139_v2 }
  0x92   :  { %v51_v45 = vpop.permute.xlu1 %50 }
  0x93   :  { %v84_v15 = vmul.f32 %v881_v57, %v51_v45 }
  0x94   :  { %v868_v47 = vpop.permute.xlu0 %65 }
  0x95   :  { %v140_v18 = vadd.f32 %v111_v43, %v84_v15  ;;  %v87_v43 = vmul.f32 %v881_v57, %v868_v47 }
  0x97   :  { %v200_v50 = vpop.permute.xlu1 %199 }
  0x98   :  { %v121_v51 = vpop.permute.xlu0 %120  ;;  %v234_v10 = vmul.f32 %v890_v0, %v200_v50 }
  0x9b   :  { %v204_v55 = vpop.permute.xlu1 %203 }
  0x9c   :  { %v877_v56 = vpop.permute.xlu0 %75  ;;  %v235_v3 = vmul.f32 %v890_v0, %v204_v55 }
  0x9d   :  { %v89_v47 = vmul.f32 %v881_v57, %v877_v56 }
  0x9e   :  { %v243_v9 = vadd.f32 %v235_v3, %v191_v4 }
  0xa0   :  { %v116_v61 = vpop.permute.xlu1 %115  ;;  %v887_v62 = vpop.permute.xlu0 %130  ;;  %649 = vtanh.f32 %v243_v9 }
  0xa1   :  { %v141_v23 = vadd.f32 %v116_v61, %v85_v17  ;;  %v264_v17 = vld [vmem:[%s958_s3 + $0x30] sm:$0xff] }
  0xa5   :  { %v160_v5 = vpop.permute.xlu1 %159  ;;  %v148_v6 = vpop.permute.xlu0 %147 }
  0xa6   :  { %v182_v8 = vmul.f32 %v883_v58, %v148_v6  ;;  %v185_v20 = vmul.f32 %v883_v58, %v160_v5 }
  0xa8   :  { %v190_v11 = vadd.f32 %v182_v8, %v138_v7  ;;  %v193_v26 = vadd.f32 %v185_v20, %v141_v23 }
  0xa9   :  { %v156_v13 = vpop.permute.xlu0 %155 }
  0xaa   :  { %v242_v12 = vadd.f32 %v234_v10, %v190_v11  ;;  %v61_v14 = vpop.permute.xlu1 %60  ;;  %v184_v16 = vmul.f32 %v883_v58, %v156_v13  ;;  %v650_v28 = vpop.eup %649 }
  0xab   :  { %v86_v35 = vmul.f32 %v881_v57, %v61_v14 }
  0xac   :  { %651 = vtanh.f32 %v242_v12  ;;  %v192_v22 = vadd.f32 %v184_v16, %v140_v18  ;;  %v260_v16 = vld [vmem:[%s958_s3 + $0x10] sm:$0xff]  ;;  %v261_v18 = vld [vmem:[%s958_s3 + $0x18] sm:$0xff] }
  0xad   :  { %v164_v37 = vpop.permute.xlu0 %163  ;;  %v142_v40 = vadd.f32 %v121_v51, %v86_v35 }
  0xae   :  { %v186_v41 = vmul.f32 %v883_v58, %v164_v37 }
  0xaf   :  { %v208_v19 = vpop.permute.xlu1 %207 }
  0xb0   :  { %v236_v21 = vmul.f32 %v890_v0, %v208_v19  ;;  %v194_v46 = vadd.f32 %v186_v41, %v142_v40  ;;  %v265_v19 = vld [vmem:[%s958_s3 + $0x38] sm:$0xff] }
  0xb1   :  { %v172_v59 = vpop.permute.xlu0 %171 }
  0xb2   :  { %v244_v24 = vadd.f32 %v236_v21, %v192_v22  ;;  %v188_v6 = vmul.f32 %v883_v58, %v172_v59 }
  0xb3   :  { %v212_v25 = vpop.permute.xlu1 %211 }
  0xb4   :  { %v237_v27 = vmul.f32 %v890_v0, %v212_v25  ;;  %653 = vtanh.f32 %v244_v24 }
  0xb6   :  { %v652_v29 = vpop.eup %651  ;;  %v245_v30 = vadd.f32 %v237_v27, %v193_v26  ;;  %v228_v63 = vpop.permute.xlu0 %227 }
  0xb7   :  { %v601_v31 = vpack.c.bf16 %v650_v28, %v652_v29  ;;  %v241_v4 = vmul.f32 %v890_v0, %v228_v63 }
  0xb8   :  { %655 = vtanh.f32 %v245_v30  ;;  %v126_v32 = vpop.permute.xlu1 %125 }
  0xb9   :  { %602 = vmatprep.subr.bf16.mxu0 %v601_v31  ;;  %617 = vmatprep.subr.bf16.mxu1 %v601_v31  ;;  %v143_v49 = vadd.f32 %v126_v32, %v87_v43 }
  0xba   :  { %604 = vmatpush3.bf16.msra.mxu0 %v601_v31  ;;  %621 = vmatpush3.bf16.msra.mxu1 %v601_v31 }
  0xbb   :  { %v287_v23 = vpop.permute.xlu0 %286 }
  0xbd   :  { %v168_v33 = vpop.permute.xlu1 %167 }
  0xbe   :  { %v654_v34 = vpop.eup %653  ;;  %v187_v44 = vmul.f32 %v883_v58, %v168_v33 }
  0xbf   :  { %v302_v25 = vpop.permute.xlu0 %301 }
  0xc0   :  { %v195_v54 = vadd.f32 %v187_v44, %v143_v49 }
  0xc2   :  { %v656_v36 = vpop.eup %655  ;;  %v71_v38 = vpop.permute.xlu1 %70 }
  0xc3   :  { %v605_v39 = vpack.c.bf16 %v656_v36, %v654_v34  ;;  %v88_v61 = vmul.f32 %v881_v57, %v71_v38  ;;  %v312_v33 = vpop.permute.xlu0 %311 }
  0xc5   :  { %606 = vmatprep.subr.bf16.mxu0 %v605_v39  ;;  %618 = vmatprep.subr.bf16.mxu1 %v605_v39  ;;  %v144_v5 = vadd.f32 %v887_v62, %v88_v61 }
  0xc6   :  { %608 = vmatpush3.bf16.msra.mxu0 %v605_v39  ;;  %622 = vmatpush3.bf16.msra.mxu1 %v605_v39 }
  0xc7   :  { %v216_v42 = vpop.permute.xlu1 %215  ;;  %v196_v12 = vadd.f32 %v188_v6, %v144_v5  ;;  %v468_v43 = vpop.permute.xlu0 %467 }
  0xc8   :  { %v238_v45 = vmul.f32 %v890_v0, %v216_v42 }
  0xca   :  { %v246_v50 = vadd.f32 %v238_v45, %v194_v46 }
  0xcb   :  { %v220_v53 = vpop.permute.xlu1 %219 }
  0xcc   :  { %v239_v51 = vmul.f32 %v890_v0, %v220_v53  ;;  %657 = vtanh.f32 %v246_v50 }
  0xce   :  { %v247_v55 = vadd.f32 %v239_v51, %v195_v54  ;;  %v478_v51 = vpop.permute.xlu0 %477 }
  0xd0   :  { %659 = vtanh.f32 %v247_v55  ;;  %v136_v60 = vpop.permute.xlu1 %135 }
  0xd1   :  { %v145_v2 = vadd.f32 %v136_v60, %v89_v47 }
  0xd5   :  { %v176_v1 = vpop.permute.xlu1 %175 }
  0xd6   :  { %v189_v3 = vmul.f32 %v883_v58, %v176_v1  ;;  %v658_v8 = vpop.eup %657  ;;  %v259_v58 = vld [vmem:[%s958_s3 + $0x8] sm:$0xff] }
  0xd8   :  { %v197_v7 = vadd.f32 %v189_v3, %v145_v2 }
  0xda   :  { %v660_v9 = vpop.eup %659  ;;  %v249_v10 = vadd.f32 %v241_v4, %v197_v7  ;;  %v224_v11 = vpop.permute.xlu1 %223 }
  0xdb   :  { %v240_v13 = vmul.f32 %v890_v0, %v224_v11  ;;  %v609_v14 = vpack.c.bf16 %v660_v9, %v658_v8  ;;  %v263_v0 = vld [vmem:[%s958_s3 + $0x28] sm:$0xff]  ;;  %v488_v4 = vpop.permute.xlu0 %487  ;;  %s710_s3 = smov [#allocation3]  }
  0xdc   :  { %661 = vtanh.f32 %v249_v10  ;;  %s541_s29 = sshll.u32 %s710_s3, 4  ;;  %s542_s29 = int_to_ptr.vmem [resolvable:$true] %s541_s29 }
  0xdd   :  { %v248_v56 = vadd.f32 %v240_v13, %v196_v12  ;;  %610 = vmatprep.subr.bf16.mxu0 %v609_v14  ;;  %619 = vmatprep.subr.bf16.mxu1 %v609_v14  ;;  %s683_s30 = scalar_lea.vmem %s542_s29, 16  ;;  %s687_s8 = scalar_lea.vmem %s542_s29, 32 }
  0xde   :  { %612 = vmatpush3.bf16.msra.mxu0 %v609_v14  ;;  %623 = vmatpush3.bf16.msra.mxu1 %v609_v14  ;;  %p684_p0 = scmp.ne.s32.totalorder %s542_s29, %s683_s30  ;;  %p688_p1 = scmp.lt.s32.totalorder %s542_s29, %s542_s29 }
  0xdf   :  { %663 = vtanh.f32 %v248_v56  ;;  %v277_v20 = vpop.permute.xlu1 %276  ;;  %v498_v14 = vpop.permute.xlu0 %497  ;;  %p689_p2 = scmp.lt.s32.totalorder %s687_s8, %s683_s30 }
  0xe1   :  { %p690_p3 = por %p689_p2, %p688_p1 }
  0xe3   :  { %v282_v21 = vpop.permute.xlu1 %281  ;;  %p691_p4 = pnand %p690_p3, %p684_p0 }
  0xe6   :  { %v662_v57 = vpop.eup %661 }
  0xe7   :  { %v292_v22 = vpop.permute.xlu1 %291 }
  0xe9   :  { %v664_v62 = vpop.eup %663 }
  0xea   :  { %v613_v15 = vpack.c.bf16 %v662_v57, %v664_v62 }
  0xeb   :  { %v297_v24 = vpop.permute.xlu1 %296 }
  0xec   :  { %614 = vmatprep.subr.bf16.mxu0 %v613_v15  ;;  %620 = vmatprep.subr.bf16.mxu1 %v613_v15 }
  0xed   :  { %616 = vmatpush3.bf16.msra.mxu0 %v613_v15  ;;  %624 = vmatpush3.bf16.msra.mxu1 %v613_v15 }
  0xef   :  { %v307_v32 = vpop.permute.xlu1 %306 }
  0xf0   :  { %590 = vmatmul.mubr.msk.f32.vlgmr.msra.gmra.mrb[0].mxu0 %vm314_vm0, %v259_v58  ;;  %596 = vmatmul.mubr.msk.f32.vlgmr.msra.gmra.mrb[0].mxu1 %vm314_vm0, %v263_v0 }
  0xf1   :  { %592 = vmatprep.mubr.msk.f32.mxu0 %vm314_vm0, %v260_v16  ;;  %598 = vmatprep.mubr.msk.f32.mxu1 %vm314_vm0, %v264_v17 }
  0xf3   :  { %v463_v41 = vpop.permute.xlu1 %462 }
  0xf4   :  { %593 = vmatmul.mubr.msk.f32.gmra.mrb[2].mxu0 %vm314_vm0, %v261_v18  ;;  %599 = vmatmul.mubr.msk.f32.gmra.mrb[2].mxu1 %vm314_vm0, %v265_v19 }
  0xf7   :  { %v473_v53 = vpop.permute.xlu1 %472 }
  0xfb   :  { %v483_v47 = vpop.permute.xlu1 %482 }
  0xff   :  { %v493_v11 = vpop.permute.xlu1 %492 }
 0x103   :  { %v525_v17 = vpop.permute.xlu1 %524 }
 0x104   :  { %v530_v19 = vrot.slane %v525_v17, %v80_v52 }
 0x1c3   :  { %v591_v26 = vpop.f32.mrb[0].mxu0  ;;  %v597_v27 = vpop.f32.mrb[0].mxu1 }
 0x1c4   :  { %v411_v28 = vadd.f32 %v591_v26, %v282_v21  ;;  %v405_v29 = vpop.f32.mrb[1].mxu0  ;;  %v425_v30 = vpop.f32.mrb[1].mxu1  ;;  %v431_v42 = vadd.f32 %v597_v27, %v302_v25 }
 0x1c5   :  { %v406_v31 = vadd.f32 %v405_v29, %v277_v20  ;;  %v426_v40 = vadd.f32 %v425_v30, %v297_v24 }
 0x1c6   :  { %665 = vtanh.f32 %v411_v28 }
 0x1c7   :  { %v594_v34 = vpop.f32.mrb[2].mxu0  ;;  %v600_v35 = vpop.f32.mrb[2].mxu1  ;;  %667 = vtanh.f32 %v406_v31 }
 0x1c8   :  { %v421_v36 = vadd.f32 %v594_v34, %v292_v22  ;;  %v415_v37 = vpop.f32.mrb[3].mxu0  ;;  %v435_v38 = vpop.f32.mrb[3].mxu1  ;;  %v441_v46 = vadd.f32 %v600_v35, %v312_v33 }
 0x1c9   :  { %v416_v39 = vadd.f32 %v415_v37, %v287_v23  ;;  %v436_v44 = vadd.f32 %v435_v38, %v307_v32 }
 0x1ca   :  { %669 = vtanh.f32 %v421_v36 }
 0x1cb   :  { %671 = vtanh.f32 %v416_v39 }
 0x1cc   :  { %673 = vtanh.f32 %v426_v40 }
 0x1cd   :  { %675 = vtanh.f32 %v431_v42 }
 0x1ce   :  { %677 = vtanh.f32 %v436_v44 }
 0x1cf   :  { %679 = vtanh.f32 %v441_v46 }
 0x1d0   :  { %v666_v45 = vpop.eup %665 }
 0x1d1   :  { %v501_v49 = vmul.f32 %v666_v45, %v468_v43  ;;  %v668_v50 = vpop.eup %667 }
 0x1d2   :  { %v500_v54 = vmul.f32 %v668_v50, %v463_v41 }
 0x1d4   :  { %v670_v55 = vpop.eup %669  ;;  %v508_v59 = vadd.f32 %v501_v49, %v500_v54 }
 0x1d5   :  { %v672_v60 = vpop.eup %671  ;;  %v503_v1 = vmul.f32 %v670_v55, %v478_v51 }
 0x1d6   :  { %v502_v61 = vmul.f32 %v672_v60, %v473_v53  ;;  %v674_v63 = vpop.eup %673 }
 0x1d7   :  { %v676_v3 = vpop.eup %675  ;;  %v504_v5 = vmul.f32 %v674_v63, %v483_v47 }
 0x1d8   :  { %v509_v2 = vadd.f32 %v508_v59, %v502_v61  ;;  %v678_v7 = vpop.eup %677  ;;  %v505_v8 = vmul.f32 %v676_v3, %v488_v4 }
 0x1d9   :  { %v680_v10 = vpop.eup %679  ;;  %v506_v12 = vmul.f32 %v678_v7, %v493_v11 }
 0x1da   :  { %v510_v6 = vadd.f32 %v509_v2, %v503_v1  ;;  %v507_v56 = vmul.f32 %v680_v10, %v498_v14 }
 0x1dc   :  { %v511_v9 = vadd.f32 %v510_v6, %v504_v5 }
 0x1de   :  { %v512_v13 = vadd.f32 %v511_v9, %v505_v8 }
 0x1e0   :  { %v513_v57 = vadd.f32 %v512_v13, %v506_v12 }
 0x1e2   :  { %v514_v62 = vadd.f32 %v513_v57, %v507_v56 }
 0x1e4   :  { %v515_v15 = vrot.slane %v514_v62, 4 }
 0x1e6   :  { %v516_v58 = vadd.f32 %v515_v15, %v514_v62 }
 0x1e8   :  { %v517_v0 = vrot.slane %v516_v58, 2 }
 0x1ea   :  { %v518_v16 = vadd.f32 %v517_v0, %v516_v58 }
 0x1ec   :  { %v519_v18 = vrot.slane %v518_v16, 1 }
 0x1ee   :  { %v520_v20 = vadd.f32 %v519_v18, %v518_v16 }
 0x1f0   :  { %v531_v21 = vadd.f32 %v530_v19, %v520_v20 }
 0x1f2   :  { %681 = vtanh.f32 %v531_v21 }
 0x1fc   :  { %v682_v22 = vpop.eup %681 }
 0x1fd   :  { %v533_v23 = vmul.f32 3.0, %v682_v22 }
 0x1ff   :  { %534 = vst [vmem:[#allocation3] sm:$0x1] %v533_v23 }
 0x200   :  { %694 = shalt.err (!%p691_p4)
}
 0x201   :  { %s695_s9 = scalar_lea.hbm %s962_s7, 16 }
 0x202   :  { %p696_p5 = scmp.ne.s32.totalorder %s962_s7, %s695_s9  ;;  %p699_p6 = scmp.lt.u32.totalorder %s695_s9, %s962_s7 }
 0x204   :  { %p701_p7 = pnand %p699_p6, %p696_p5 }
 0x206   :  { %704 = shalt.err (!%p701_p7)
}
 0x207   :  { %544 = dma.vmem_to_hbm [thread:$0]  %s542_s29, 16, %s962_s7, [#allocation4]  }
 0x208   :  { %705 = dma.done.wait [#allocation4], 16  }
 0x209   :  { %706 = vsyncadd [#allocation4], 4294967280 }
 0x20a   :  { %548 = vsyncpa [#allocation4], 1 }

</bundles_post_ra>
